<compile_context>
chip_gen: v7x
topology: tpu7x:2x2x1
jax: 0.10.0
libtpu: 0.0.40
codegen_flags: <defaults>
</compile_context>

<pallas_src>
import functools

import jax
import jax.numpy as jnp
from jax.experimental import pallas as pl
from jax.experimental.pallas import tpu as pltpu

EPS = 1e-5  # nn.LayerNorm default


def _layernorm(x, gamma, beta):
    # x: (n, d) f32, gamma/beta: (1, d) f32 -- biased variance, matches nn.LayerNorm
    mu = jnp.mean(x, axis=-1, keepdims=True)
    var = jnp.mean((x - mu) ** 2, axis=-1, keepdims=True)
    return (x - mu) * jax.lax.rsqrt(var + EPS) * gamma + beta


# ----------------------------- kernels ------------------------------------ #

def layer_kernel(x_ref,
                 ag_ref, ab_ref, wq_ref, wk_ref, wv_ref, wo_ref,
                 fg_ref, fb_ref, w1_ref, b1_ref, w2_ref, b2_ref,
                 o_ref, *, heads, dim_head):
    """Fused transformer layer (attn + residual, ff + residual) for one batch
    element per grid step."""
    x = x_ref[0].astype(jnp.float32)                       # (N, D)
    n, d = x.shape
    scale = dim_head ** -0.5

    # ------------------------- attention -------------------------
    xn = _layernorm(x, ag_ref[...], ab_ref[...])
    xh = jnp.broadcast_to(xn.astype(jnp.bfloat16)[None], (heads, n, d))  # (H,N,D)

    # batched per-head projections: bf16 operands, f32 accumulation on the MXU
    q = jnp.einsum('hnd,hdk->hnk', xh, wq_ref[...],
                   preferred_element_type=jnp.float32)      # (H, N, Dh)
    k = jnp.einsum('hnd,hdk->hnk', xh, wk_ref[...],
                   preferred_element_type=jnp.float32)
    v = jnp.einsum('hnd,hdk->hnk', xh, wv_ref[...],
                   preferred_element_type=jnp.float32)
    q = q * scale                                           # fold scale into q

    s = jnp.einsum('hnd,hmd->hnm',
                   q.astype(jnp.bfloat16), k.astype(jnp.bfloat16),
                   preferred_element_type=jnp.float32)      # (H, N, N)
    s = s - jnp.max(s, axis=-1, keepdims=True)              # stable softmax, f32
    e = jnp.exp(s)
    p = e * pl.reciprocal(jnp.sum(e, axis=-1, keepdims=True), approx=True)

    oh = jnp.einsum('hnm,hmd->hnd',
                    p.astype(jnp.bfloat16), v.astype(jnp.bfloat16),
                    preferred_element_type=jnp.float32)     # (H, N, Dh)

    # out_concat @ Wo  ==  sum_h out_h @ Wo_h   (no lane-narrow concatenate)
    proj = jnp.einsum('hnd,hdm->hnm',
                      oh.astype(jnp.bfloat16), wo_ref[...],
                      preferred_element_type=jnp.float32)   # (H, N, D)
    x = x + jnp.sum(proj, axis=0)                           # residual 1 (f32)

    # ------------------------ feed-forward ------------------------
    yn = _layernorm(x, fg_ref[...], fb_ref[...])
    h = jnp.dot(yn.astype(jnp.bfloat16), w1_ref[...],
                preferred_element_type=jnp.float32) + b1_ref[...]
    # exact GELU (erf formulation, PyTorch nn.GELU default), f32
    h = 0.5 * h * (1.0 + jax.lax.erf(h * 0.7071067811865475))
    y = jnp.dot(h.astype(jnp.bfloat16), w2_ref[...],
                preferred_element_type=jnp.float32) + b2_ref[...]

    o_ref[0] = (x + y).astype(o_ref.dtype)                  # residual 2


def norm_kernel(x_ref, g_ref, b_ref, o_ref):
    x = x_ref[0].astype(jnp.float32)
    o_ref[0] = _layernorm(x, g_ref[...], b_ref[...]).astype(o_ref.dtype)


# ----------------------------- wrappers ------------------------------------ #

def _full(shape):
    nd = len(shape)
    return pl.BlockSpec(shape, lambda b, _nd=nd: (0,) * _nd)


_COMPILER_PARAMS = pltpu.CompilerParams(
    dimension_semantics=("parallel",),          # batch axis -> both TCs on v7x
    vmem_limit_bytes=48 * 1024 * 1024,          # explicit budget (v7x has 64 MiB)
)


def layer_block(x, ap, fp):
    B, N, D = x.shape
    H, _, Dh = ap["wq"].shape
    mlp = fp["w1"].shape[1]
    kernel = functools.partial(layer_kernel, heads=H, dim_head=Dh)
    return pl.pallas_call(
        kernel,
        out_shape=jax.ShapeDtypeStruct((B, N, D), x.dtype),
        grid=(B,),
        in_specs=[
            pl.BlockSpec((1, N, D), lambda b: (b, 0, 0)),   # x
            _full((1, D)), _full((1, D)),                   # attn LN gamma/beta
            _full((H, D, Dh)),                              # wq (bf16)
            _full((H, D, Dh)),                              # wk (bf16)
            _full((H, D, Dh)),                              # wv (bf16)
            _full((H, Dh, D)),                              # wo (bf16)
            _full((1, D)), _full((1, D)),                   # ff LN gamma/beta
            _full((D, mlp)), _full((1, mlp)),               # w1 (bf16), b1
            _full((mlp, D)), _full((1, D)),                 # w2 (bf16), b2
        ],
        out_specs=pl.BlockSpec((1, N, D), lambda b: (b, 0, 0)),
        compiler_params=_COMPILER_PARAMS,
    )(x, ap["ln_g"], ap["ln_b"], ap["wq"], ap["wk"], ap["wv"], ap["wo"],
      fp["ln_g"], fp["ln_b"], fp["w1"], fp["b1"], fp["w2"], fp["b2"])


def final_norm(x, g, b):
    B, N, D = x.shape
    return pl.pallas_call(
        norm_kernel,
        out_shape=jax.ShapeDtypeStruct((B, N, D), x.dtype),
        grid=(B,),
        in_specs=[pl.BlockSpec((1, N, D), lambda b: (b, 0, 0)),
                  _full((1, D)), _full((1, D))],
        out_specs=pl.BlockSpec((1, N, D), lambda b: (b, 0, 0)),
        compiler_params=_COMPILER_PARAMS,
    )(x, g, b)


def transformer_forward(x, params):
    for layer in params["layers"]:
        x = layer_block(x, layer["attn"], layer["ff"])      # attn(x)+x ; ff(x)+x
    return final_norm(x, params["norm_g"], params["norm_b"])


# ----------------------------- param init ---------------------------------- #

def init_params(key, dim, depth, heads, dim_head, mlp_dim):
    inner = heads * dim_head
    layers = []
    for _ in range(depth):
        key, k1, k2, k3, k4 = jax.random.split(key, 5)
        # PyTorch-equivalent dense weights (transposed: in_features x out_features)
        wqkv = 0.02 * jax.random.normal(k1, (dim, 3 * inner), jnp.float32)
        wo = 0.02 * jax.random.normal(k2, (inner, dim), jnp.float32)
        # kernel layout: per-head split, bf16 MXU operands
        wqkv_h = wqkv.reshape(dim, 3, heads, dim_head).transpose(1, 2, 0, 3)  # (3,H,D,Dh)
        attn_p = {
            "ln_g": jnp.ones((1, dim), jnp.float32),
            "ln_b": jnp.zeros((1, dim), jnp.float32),
            "wq": wqkv_h[0].astype(jnp.bfloat16),
            "wk": wqkv_h[1].astype(jnp.bfloat16),
            "wv": wqkv_h[2].astype(jnp.bfloat16),
            "wo": wo.reshape(heads, dim_head, dim).astype(jnp.bfloat16),
        }
        ff_p = {
            "ln_g": jnp.ones((1, dim), jnp.float32),
            "ln_b": jnp.zeros((1, dim), jnp.float32),
            "w1": (0.02 * jax.random.normal(k3, (dim, mlp_dim), jnp.float32)
                   ).astype(jnp.bfloat16),
            "b1": jnp.zeros((1, mlp_dim), jnp.float32),
            "w2": (0.02 * jax.random.normal(k4, (mlp_dim, dim), jnp.float32)
                   ).astype(jnp.bfloat16),
            "b2": jnp.zeros((1, dim), jnp.float32),
        }
        layers.append({"attn": attn_p, "ff": ff_p})
    return {
        "layers": layers,
        "norm_g": jnp.ones((1, dim), jnp.float32),
        "norm_b": jnp.zeros((1, dim), jnp.float32),
    }


# ----------------------------- main ----------------------------------------- #

if __name__ == "__main__":
    B, N = 2, 8                    # batch, sequence length
    dim, depth = 32, 2
    heads, dim_head, mlp_dim = 4, 8, 64

    key = jax.random.PRNGKey(0)
    key, xk = jax.random.split(key)
    x = jax.random.normal(xk, (B, N, dim), jnp.float32)

    params = init_params(key, dim, depth, heads, dim_head, mlp_dim)

    fwd = jax.jit(transformer_forward)
    out = fwd(x, params)
    jax.block_until_ready(out)
    assert out.shape == (B, N, dim)
    print("KERNEL_OK")
</pallas_src>

<mosaic_0001>
module attributes {stable_mosaic.version = 11 : i64} {
  func.func @layer_kernel(%arg0: i32, %arg1: memref<1x8x32xf32, #tpu.memory_space<vmem>>, %arg2: memref<1x32xf32, #tpu.memory_space<vmem>>, %arg3: memref<1x32xf32, #tpu.memory_space<vmem>>, %arg4: memref<4x32x8xbf16, #tpu.memory_space<vmem>>, %arg5: memref<4x32x8xbf16, #tpu.memory_space<vmem>>, %arg6: memref<4x32x8xbf16, #tpu.memory_space<vmem>>, %arg7: memref<4x8x32xbf16, #tpu.memory_space<vmem>>, %arg8: memref<1x32xf32, #tpu.memory_space<vmem>>, %arg9: memref<1x32xf32, #tpu.memory_space<vmem>>, %arg10: memref<32x64xbf16, #tpu.memory_space<vmem>>, %arg11: memref<1x64xf32, #tpu.memory_space<vmem>>, %arg12: memref<64x32xbf16, #tpu.memory_space<vmem>>, %arg13: memref<1x32xf32, #tpu.memory_space<vmem>>, %arg14: memref<1x8x32xf32, #tpu.memory_space<vmem>>) attributes {dimension_semantics = [#tpu.dimension_semantics<parallel>], iteration_bounds = array<i64: 2>, scalar_prefetch = 0 : i64, scratch_operands = 0 : i64, tpu.core_type = #tpu.core_type<tc>, window_params = [{transform_indices = @transform_0, window_bounds = array<i64: 1, 8, 32>}, {pipeline_mode = #tpu.pipeline_mode<synchronous>, transform_indices = @transform_1, window_bounds = array<i64: 1, 32>}, {pipeline_mode = #tpu.pipeline_mode<synchronous>, transform_indices = @transform_2, window_bounds = array<i64: 1, 32>}, {pipeline_mode = #tpu.pipeline_mode<synchronous>, transform_indices = @transform_3, window_bounds = array<i64: 4, 32, 8>}, {pipeline_mode = #tpu.pipeline_mode<synchronous>, transform_indices = @transform_4, window_bounds = array<i64: 4, 32, 8>}, {pipeline_mode = #tpu.pipeline_mode<synchronous>, transform_indices = @transform_5, window_bounds = array<i64: 4, 32, 8>}, {pipeline_mode = #tpu.pipeline_mode<synchronous>, transform_indices = @transform_6, window_bounds = array<i64: 4, 8, 32>}, {pipeline_mode = #tpu.pipeline_mode<synchronous>, transform_indices = @transform_7, window_bounds = array<i64: 1, 32>}, {pipeline_mode = #tpu.pipeline_mode<synchronous>, transform_indices = @transform_8, window_bounds = array<i64: 1, 32>}, {pipeline_mode = #tpu.pipeline_mode<synchronous>, transform_indices = @transform_9, window_bounds = array<i64: 32, 64>}, {pipeline_mode = #tpu.pipeline_mode<synchronous>, transform_indices = @transform_10, window_bounds = array<i64: 1, 64>}, {pipeline_mode = #tpu.pipeline_mode<synchronous>, transform_indices = @transform_11, window_bounds = array<i64: 64, 32>}, {pipeline_mode = #tpu.pipeline_mode<synchronous>, transform_indices = @transform_12, window_bounds = array<i64: 1, 32>}, {transform_indices = @transform_13, window_bounds = array<i64: 1, 8, 32>}]} {
    %c0 = arith.constant 0 : index
    %c0_0 = arith.constant 0 : index
    %c0_1 = arith.constant 0 : index
    %0 = vector.load %arg1[%c0, %c0_0, %c0_1] : memref<1x8x32xf32, #tpu.memory_space<vmem>>, vector<1x8x32xf32>
    %1 = vector.shape_cast %0 : vector<1x8x32xf32> to vector<8x32xf32>
    %c0_2 = arith.constant 0 : index
    %c0_3 = arith.constant 0 : index
    %2 = vector.load %arg2[%c0_2, %c0_3] : memref<1x32xf32, #tpu.memory_space<vmem>>, vector<1x32xf32>
    %c0_4 = arith.constant 0 : index
    %c0_5 = arith.constant 0 : index
    %3 = vector.load %arg3[%c0_4, %c0_5] : memref<1x32xf32, #tpu.memory_space<vmem>>, vector<1x32xf32>
    %cst = arith.constant dense<0.000000e+00> : vector<8xf32>
    %4 = vector.multi_reduction <add>, %1, %cst [1] : vector<8x32xf32> to vector<8xf32>
    %5 = vector.shape_cast %4 : vector<8xf32> to vector<8x1xf32>
    %cst_6 = arith.constant 3.200000e+01 : f32
    %6 = vector.broadcast %cst_6 : f32 to vector<8x1xf32>
    %7 = arith.divf %5, %6 : vector<8x1xf32>
    %8 = vector.broadcast %7 : vector<8x1xf32> to vector<8x32xf32>
    %9 = arith.subf %1, %8 : vector<8x32xf32>
    %10 = arith.mulf %9, %9 : vector<8x32xf32>
    %cst_7 = arith.constant dense<0.000000e+00> : vector<8xf32>
    %11 = vector.multi_reduction <add>, %10, %cst_7 [1] : vector<8x32xf32> to vector<8xf32>
    %12 = vector.shape_cast %11 : vector<8xf32> to vector<8x1xf32>
    %cst_8 = arith.constant 3.200000e+01 : f32
    %13 = vector.broadcast %cst_8 : f32 to vector<8x1xf32>
    %14 = arith.divf %12, %13 : vector<8x1xf32>
    %15 = vector.broadcast %7 : vector<8x1xf32> to vector<8x32xf32>
    %16 = arith.subf %1, %15 : vector<8x32xf32>
    %cst_9 = arith.constant 9.99999974E-6 : f32
    %17 = vector.broadcast %cst_9 : f32 to vector<8x1xf32>
    %18 = arith.addf %14, %17 : vector<8x1xf32>
    %19 = math.rsqrt %18 : vector<8x1xf32>
    %20 = vector.broadcast %19 : vector<8x1xf32> to vector<8x32xf32>
    %21 = arith.mulf %16, %20 : vector<8x32xf32>
    %22 = vector.broadcast %2 : vector<1x32xf32> to vector<8x32xf32>
    %23 = arith.mulf %21, %22 : vector<8x32xf32>
    %24 = vector.broadcast %3 : vector<1x32xf32> to vector<8x32xf32>
    %25 = arith.addf %23, %24 : vector<8x32xf32>
    %26 = arith.truncf %25 : vector<8x32xf32> to vector<8x32xbf16>
    %27 = vector.shape_cast %26 : vector<8x32xbf16> to vector<1x8x32xbf16>
    %28 = vector.shape_cast %27 : vector<1x8x32xbf16> to vector<1x8x32xbf16>
    %29 = vector.broadcast %28 : vector<1x8x32xbf16> to vector<4x8x32xbf16>
    %c0_10 = arith.constant 0 : index
    %c0_11 = arith.constant 0 : index
    %c0_12 = arith.constant 0 : index
    %30 = vector.load %arg4[%c0_10, %c0_11, %c0_12] : memref<4x32x8xbf16, #tpu.memory_space<vmem>>, vector<4x32x8xbf16>
    "tpu.trace_start"() <{level = 10 : i32, message = "hnd,hdk->hnk"}> : () -> ()
    %cst_13 = arith.constant dense<0.000000e+00> : vector<4x8x8xf32>
    %31 = tpu.matmul %29, %30, %cst_13 {dimension_numbers = #tpu.dot_dimension_numbers<[2], [1], [1], [2], [0, 0, 0, 1, 1, 2], [0], [0]>} : vector<4x8x32xbf16>, vector<4x32x8xbf16>, vector<4x8x8xf32> -> vector<4x8x8xf32>
    "tpu.trace_stop"() : () -> ()
    %c0_14 = arith.constant 0 : index
    %c0_15 = arith.constant 0 : index
    %c0_16 = arith.constant 0 : index
    %32 = vector.load %arg5[%c0_14, %c0_15, %c0_16] : memref<4x32x8xbf16, #tpu.memory_space<vmem>>, vector<4x32x8xbf16>
    "tpu.trace_start"() <{level = 10 : i32, message = "hnd,hdk->hnk"}> : () -> ()
    %cst_17 = arith.constant dense<0.000000e+00> : vector<4x8x8xf32>
    %33 = tpu.matmul %29, %32, %cst_17 {dimension_numbers = #tpu.dot_dimension_numbers<[2], [1], [1], [2], [0, 0, 0, 1, 1, 2], [0], [0]>} : vector<4x8x32xbf16>, vector<4x32x8xbf16>, vector<4x8x8xf32> -> vector<4x8x8xf32>
    "tpu.trace_stop"() : () -> ()
    %c0_18 = arith.constant 0 : index
    %c0_19 = arith.constant 0 : index
    %c0_20 = arith.constant 0 : index
    %34 = vector.load %arg6[%c0_18, %c0_19, %c0_20] : memref<4x32x8xbf16, #tpu.memory_space<vmem>>, vector<4x32x8xbf16>
    "tpu.trace_start"() <{level = 10 : i32, message = "hnd,hdk->hnk"}> : () -> ()
    %cst_21 = arith.constant dense<0.000000e+00> : vector<4x8x8xf32>
    %35 = tpu.matmul %29, %34, %cst_21 {dimension_numbers = #tpu.dot_dimension_numbers<[2], [1], [1], [2], [0, 0, 0, 1, 1, 2], [0], [0]>} : vector<4x8x32xbf16>, vector<4x32x8xbf16>, vector<4x8x8xf32> -> vector<4x8x8xf32>
    "tpu.trace_stop"() : () -> ()
    %cst_22 = arith.constant 0.353553385 : f32
    %36 = vector.broadcast %cst_22 : f32 to vector<4x8x8xf32>
    %37 = arith.mulf %31, %36 : vector<4x8x8xf32>
    %38 = arith.truncf %37 : vector<4x8x8xf32> to vector<4x8x8xbf16>
    %39 = arith.truncf %33 : vector<4x8x8xf32> to vector<4x8x8xbf16>
    "tpu.trace_start"() <{level = 10 : i32, message = "hnd,hmd->hnm"}> : () -> ()
    %cst_23 = arith.constant dense<0.000000e+00> : vector<4x8x8xf32>
    %40 = tpu.matmul %38, %39, %cst_23 {dimension_numbers = #tpu.dot_dimension_numbers<[2], [2], [1], [1], [0, 0, 0, 1, 1, 1], [0], [0]>} : vector<4x8x8xbf16>, vector<4x8x8xbf16>, vector<4x8x8xf32> -> vector<4x8x8xf32>
    "tpu.trace_stop"() : () -> ()
    %cst_24 = arith.constant dense<0xFF800000> : vector<4x8xf32>
    %41 = vector.multi_reduction <maximumf>, %40, %cst_24 [2] : vector<4x8x8xf32> to vector<4x8xf32>
    %42 = vector.shape_cast %41 : vector<4x8xf32> to vector<4x8x1xf32>
    %43 = vector.broadcast %42 : vector<4x8x1xf32> to vector<4x8x8xf32>
    %44 = arith.subf %40, %43 : vector<4x8x8xf32>
    %45 = math.exp %44 : vector<4x8x8xf32>
    %cst_25 = arith.constant dense<0.000000e+00> : vector<4x8xf32>
    %46 = vector.multi_reduction <add>, %45, %cst_25 [2] : vector<4x8x8xf32> to vector<4x8xf32>
    %47 = vector.shape_cast %46 : vector<4x8xf32> to vector<4x8x1xf32>
    %48 = tpu.reciprocal %47 {approx = true} : vector<4x8x1xf32> -> vector<4x8x1xf32>
    %49 = vector.broadcast %48 : vector<4x8x1xf32> to vector<4x8x8xf32>
    %50 = arith.mulf %45, %49 : vector<4x8x8xf32>
    %51 = arith.truncf %50 : vector<4x8x8xf32> to vector<4x8x8xbf16>
    %52 = arith.truncf %35 : vector<4x8x8xf32> to vector<4x8x8xbf16>
    "tpu.trace_start"() <{level = 10 : i32, message = "hnm,hmd->hnd"}> : () -> ()
    %cst_26 = arith.constant dense<0.000000e+00> : vector<4x8x8xf32>
    %53 = tpu.matmul %51, %52, %cst_26 {dimension_numbers = #tpu.dot_dimension_numbers<[2], [1], [1], [2], [0, 0, 0, 1, 1, 2], [0], [0]>} : vector<4x8x8xbf16>, vector<4x8x8xbf16>, vector<4x8x8xf32> -> vector<4x8x8xf32>
    "tpu.trace_stop"() : () -> ()
    %54 = arith.truncf %53 : vector<4x8x8xf32> to vector<4x8x8xbf16>
    %c0_27 = arith.constant 0 : index
    %c0_28 = arith.constant 0 : index
    %c0_29 = arith.constant 0 : index
    %55 = vector.load %arg7[%c0_27, %c0_28, %c0_29] : memref<4x8x32xbf16, #tpu.memory_space<vmem>>, vector<4x8x32xbf16>
    "tpu.trace_start"() <{level = 10 : i32, message = "hnd,hdm->hnm"}> : () -> ()
    %cst_30 = arith.constant dense<0.000000e+00> : vector<4x8x32xf32>
    %56 = tpu.matmul %54, %55, %cst_30 {dimension_numbers = #tpu.dot_dimension_numbers<[2], [1], [1], [2], [0, 0, 0, 1, 1, 2], [0], [0]>} : vector<4x8x8xbf16>, vector<4x8x32xbf16>, vector<4x8x32xf32> -> vector<4x8x32xf32>
    "tpu.trace_stop"() : () -> ()
    %cst_31 = arith.constant dense<0.000000e+00> : vector<8x32xf32>
    %57 = vector.multi_reduction <add>, %56, %cst_31 [0] : vector<4x8x32xf32> to vector<8x32xf32>
    %58 = arith.addf %1, %57 : vector<8x32xf32>
    %c0_32 = arith.constant 0 : index
    %c0_33 = arith.constant 0 : index
    %59 = vector.load %arg8[%c0_32, %c0_33] : memref<1x32xf32, #tpu.memory_space<vmem>>, vector<1x32xf32>
    %c0_34 = arith.constant 0 : index
    %c0_35 = arith.constant 0 : index
    %60 = vector.load %arg9[%c0_34, %c0_35] : memref<1x32xf32, #tpu.memory_space<vmem>>, vector<1x32xf32>
    %cst_36 = arith.constant dense<0.000000e+00> : vector<8xf32>
    %61 = vector.multi_reduction <add>, %58, %cst_36 [1] : vector<8x32xf32> to vector<8xf32>
    %62 = vector.shape_cast %61 : vector<8xf32> to vector<8x1xf32>
    %cst_37 = arith.constant 3.200000e+01 : f32
    %63 = vector.broadcast %cst_37 : f32 to vector<8x1xf32>
    %64 = arith.divf %62, %63 : vector<8x1xf32>
    %65 = vector.broadcast %64 : vector<8x1xf32> to vector<8x32xf32>
    %66 = arith.subf %58, %65 : vector<8x32xf32>
    %67 = arith.mulf %66, %66 : vector<8x32xf32>
    %cst_38 = arith.constant dense<0.000000e+00> : vector<8xf32>
    %68 = vector.multi_reduction <add>, %67, %cst_38 [1] : vector<8x32xf32> to vector<8xf32>
    %69 = vector.shape_cast %68 : vector<8xf32> to vector<8x1xf32>
    %cst_39 = arith.constant 3.200000e+01 : f32
    %70 = vector.broadcast %cst_39 : f32 to vector<8x1xf32>
    %71 = arith.divf %69, %70 : vector<8x1xf32>
    %72 = vector.broadcast %64 : vector<8x1xf32> to vector<8x32xf32>
    %73 = arith.subf %58, %72 : vector<8x32xf32>
    %cst_40 = arith.constant 9.99999974E-6 : f32
    %74 = vector.broadcast %cst_40 : f32 to vector<8x1xf32>
    %75 = arith.addf %71, %74 : vector<8x1xf32>
    %76 = math.rsqrt %75 : vector<8x1xf32>
    %77 = vector.broadcast %76 : vector<8x1xf32> to vector<8x32xf32>
    %78 = arith.mulf %73, %77 : vector<8x32xf32>
    %79 = vector.broadcast %59 : vector<1x32xf32> to vector<8x32xf32>
    %80 = arith.mulf %78, %79 : vector<8x32xf32>
    %81 = vector.broadcast %60 : vector<1x32xf32> to vector<8x32xf32>
    %82 = arith.addf %80, %81 : vector<8x32xf32>
    %83 = arith.truncf %82 : vector<8x32xf32> to vector<8x32xbf16>
    %c0_41 = arith.constant 0 : index
    %c0_42 = arith.constant 0 : index
    %84 = vector.load %arg10[%c0_41, %c0_42] : memref<32x64xbf16, #tpu.memory_space<vmem>>, vector<32x64xbf16>
    %cst_43 = arith.constant dense<0.000000e+00> : vector<8x64xf32>
    %85 = tpu.matmul %83, %84, %cst_43 {dimension_numbers = #tpu.dot_dimension_numbers<[1], [0], [0], [1], [0, 0, 1, 1], [], []>} : vector<8x32xbf16>, vector<32x64xbf16>, vector<8x64xf32> -> vector<8x64xf32>
    %c0_44 = arith.constant 0 : index
    %c0_45 = arith.constant 0 : index
    %86 = vector.load %arg11[%c0_44, %c0_45] : memref<1x64xf32, #tpu.memory_space<vmem>>, vector<1x64xf32>
    %87 = vector.broadcast %86 : vector<1x64xf32> to vector<8x64xf32>
    %88 = arith.addf %85, %87 : vector<8x64xf32>
    %cst_46 = arith.constant 5.000000e-01 : f32
    %89 = vector.broadcast %cst_46 : f32 to vector<8x64xf32>
    %90 = arith.mulf %89, %88 : vector<8x64xf32>
    %cst_47 = arith.constant 0.707106769 : f32
    %91 = vector.broadcast %cst_47 : f32 to vector<8x64xf32>
    %92 = arith.mulf %88, %91 : vector<8x64xf32>
    %93 = math.erf %92 : vector<8x64xf32>
    %cst_48 = arith.constant 1.000000e+00 : f32
    %94 = vector.broadcast %cst_48 : f32 to vector<8x64xf32>
    %95 = arith.addf %94, %93 : vector<8x64xf32>
    %96 = arith.mulf %90, %95 : vector<8x64xf32>
    %97 = arith.truncf %96 : vector<8x64xf32> to vector<8x64xbf16>
    %c0_49 = arith.constant 0 : index
    %c0_50 = arith.constant 0 : index
    %98 = vector.load %arg12[%c0_49, %c0_50] : memref<64x32xbf16, #tpu.memory_space<vmem>>, vector<64x32xbf16>
    %cst_51 = arith.constant dense<0.000000e+00> : vector<8x32xf32>
    %99 = tpu.matmul %97, %98, %cst_51 {dimension_numbers = #tpu.dot_dimension_numbers<[1], [0], [0], [1], [0, 0, 1, 1], [], []>} : vector<8x64xbf16>, vector<64x32xbf16>, vector<8x32xf32> -> vector<8x32xf32>
    %c0_52 = arith.constant 0 : index
    %c0_53 = arith.constant 0 : index
    %100 = vector.load %arg13[%c0_52, %c0_53] : memref<1x32xf32, #tpu.memory_space<vmem>>, vector<1x32xf32>
    %101 = vector.broadcast %100 : vector<1x32xf32> to vector<8x32xf32>
    %102 = arith.addf %99, %101 : vector<8x32xf32>
    %103 = arith.addf %58, %102 : vector<8x32xf32>
    %c0_54 = arith.constant 0 : index
    %c0_55 = arith.constant 0 : index
    %c0_56 = arith.constant 0 : index
    %104 = vector.load %arg14[%c0_54, %c0_55, %c0_56] : memref<1x8x32xf32, #tpu.memory_space<vmem>>, vector<1x8x32xf32>
    %105 = vector.shape_cast %104 : vector<1x8x32xf32> to vector<8x32xf32>
    %106 = vector.shape_cast %103 : vector<8x32xf32> to vector<1x8x32xf32>
    tpu.vector_store %arg14[%c0_54, %c0_55, %c0_56], %106 {strides = array<i32>} : memref<1x8x32xf32, #tpu.memory_space<vmem>>, vector<1x8x32xf32>,
    return
  }
  func.func @transform_0(%arg0: i32) -> (i32, i32, i32) {
    %c0_i32 = arith.constant 0 : i32
    %c0_i32_0 = arith.constant 0 : i32
    %c0_i32_1 = arith.constant 0 : i32
    return %arg0, %c0_i32, %c0_i32_0 : i32, i32, i32
  }
  func.func @transform_1(%arg0: i32) -> (i32, i32) {
    %c0_i32 = arith.constant 0 : i32
    %c0_i32_0 = arith.constant 0 : i32
    %c0_i32_1 = arith.constant 0 : i32
    return %c0_i32, %c0_i32_0 : i32, i32
  }
  func.func @transform_2(%arg0: i32) -> (i32, i32) {
    %c0_i32 = arith.constant 0 : i32
    %c0_i32_0 = arith.constant 0 : i32
    %c0_i32_1 = arith.constant 0 : i32
    return %c0_i32, %c0_i32_0 : i32, i32
  }
  func.func @transform_3(%arg0: i32) -> (i32, i32, i32) {
    %c0_i32 = arith.constant 0 : i32
    %c0_i32_0 = arith.constant 0 : i32
    %c0_i32_1 = arith.constant 0 : i32
    %c0_i32_2 = arith.constant 0 : i32
    return %c0_i32, %c0_i32_0, %c0_i32_1 : i32, i32, i32
  }
  func.func @transform_4(%arg0: i32) -> (i32, i32, i32) {
    %c0_i32 = arith.constant 0 : i32
    %c0_i32_0 = arith.constant 0 : i32
    %c0_i32_1 = arith.constant 0 : i32
    %c0_i32_2 = arith.constant 0 : i32
    return %c0_i32, %c0_i32_0, %c0_i32_1 : i32, i32, i32
  }
  func.func @transform_5(%arg0: i32) -> (i32, i32, i32) {
    %c0_i32 = arith.constant 0 : i32
    %c0_i32_0 = arith.constant 0 : i32
    %c0_i32_1 = arith.constant 0 : i32
    %c0_i32_2 = arith.constant 0 : i32
    return %c0_i32, %c0_i32_0, %c0_i32_1 : i32, i32, i32
  }
  func.func @transform_6(%arg0: i32) -> (i32, i32, i32) {
    %c0_i32 = arith.constant 0 : i32
    %c0_i32_0 = arith.constant 0 : i32
    %c0_i32_1 = arith.constant 0 : i32
    %c0_i32_2 = arith.constant 0 : i32
    return %c0_i32, %c0_i32_0, %c0_i32_1 : i32, i32, i32
  }
  func.func @transform_7(%arg0: i32) -> (i32, i32) {
    %c0_i32 = arith.constant 0 : i32
    %c0_i32_0 = arith.constant 0 : i32
    %c0_i32_1 = arith.constant 0 : i32
    return %c0_i32, %c0_i32_0 : i32, i32
  }
  func.func @transform_8(%arg0: i32) -> (i32, i32) {
    %c0_i32 = arith.constant 0 : i32
    %c0_i32_0 = arith.constant 0 : i32
    %c0_i32_1 = arith.constant 0 : i32
    return %c0_i32, %c0_i32_0 : i32, i32
  }
  func.func @transform_9(%arg0: i32) -> (i32, i32) {
    %c0_i32 = arith.constant 0 : i32
    %c0_i32_0 = arith.constant 0 : i32
    %c0_i32_1 = arith.constant 0 : i32
    return %c0_i32, %c0_i32_0 : i32, i32
  }
  func.func @transform_10(%arg0: i32) -> (i32, i32) {
    %c0_i32 = arith.constant 0 : i32
    %c0_i32_0 = arith.constant 0 : i32
    %c0_i32_1 = arith.constant 0 : i32
    return %c0_i32, %c0_i32_0 : i32, i32
  }
  func.func @transform_11(%arg0: i32) -> (i32, i32) {
    %c0_i32 = arith.constant 0 : i32
    %c0_i32_0 = arith.constant 0 : i32
    %c0_i32_1 = arith.constant 0 : i32
    return %c0_i32, %c0_i32_0 : i32, i32
  }
  func.func @transform_12(%arg0: i32) -> (i32, i32) {
    %c0_i32 = arith.constant 0 : i32
    %c0_i32_0 = arith.constant 0 : i32
    %c0_i32_1 = arith.constant 0 : i32
    return %c0_i32, %c0_i32_0 : i32, i32
  }
  func.func @transform_13(%arg0: i32) -> (i32, i32, i32) {
    %c0_i32 = arith.constant 0 : i32
    %c0_i32_0 = arith.constant 0 : i32
    %c0_i32_1 = arith.constant 0 : i32
    return %arg0, %c0_i32, %c0_i32_0 : i32, i32, i32
  }
}

module attributes {stable_mosaic.version = 11 : i64} {
  func.func @norm_kernel(%arg0: i32, %arg1: memref<1x8x32xf32, #tpu.memory_space<vmem>>, %arg2: memref<1x32xf32, #tpu.memory_space<vmem>>, %arg3: memref<1x32xf32, #tpu.memory_space<vmem>>, %arg4: memref<1x8x32xf32, #tpu.memory_space<vmem>>) attributes {dimension_semantics = [#tpu.dimension_semantics<parallel>], iteration_bounds = array<i64: 2>, scalar_prefetch = 0 : i64, scratch_operands = 0 : i64, tpu.core_type = #tpu.core_type<tc>, window_params = [{transform_indices = @transform_0, window_bounds = array<i64: 1, 8, 32>}, {pipeline_mode = #tpu.pipeline_mode<synchronous>, transform_indices = @transform_1, window_bounds = array<i64: 1, 32>}, {pipeline_mode = #tpu.pipeline_mode<synchronous>, transform_indices = @transform_2, window_bounds = array<i64: 1, 32>}, {transform_indices = @transform_3, window_bounds = array<i64: 1, 8, 32>}]} {
    %c0 = arith.constant 0 : index
    %c0_0 = arith.constant 0 : index
    %c0_1 = arith.constant 0 : index
    %0 = vector.load %arg1[%c0, %c0_0, %c0_1] : memref<1x8x32xf32, #tpu.memory_space<vmem>>, vector<1x8x32xf32>
    %1 = vector.shape_cast %0 : vector<1x8x32xf32> to vector<8x32xf32>
    %c0_2 = arith.constant 0 : index
    %c0_3 = arith.constant 0 : index
    %2 = vector.load %arg2[%c0_2, %c0_3] : memref<1x32xf32, #tpu.memory_space<vmem>>, vector<1x32xf32>
    %c0_4 = arith.constant 0 : index
    %c0_5 = arith.constant 0 : index
    %3 = vector.load %arg3[%c0_4, %c0_5] : memref<1x32xf32, #tpu.memory_space<vmem>>, vector<1x32xf32>
    %cst = arith.constant dense<0.000000e+00> : vector<8xf32>
    %4 = vector.multi_reduction <add>, %1, %cst [1] : vector<8x32xf32> to vector<8xf32>
    %5 = vector.shape_cast %4 : vector<8xf32> to vector<8x1xf32>
    %cst_6 = arith.constant 3.200000e+01 : f32
    %6 = vector.broadcast %cst_6 : f32 to vector<8x1xf32>
    %7 = arith.divf %5, %6 : vector<8x1xf32>
    %8 = vector.broadcast %7 : vector<8x1xf32> to vector<8x32xf32>
    %9 = arith.subf %1, %8 : vector<8x32xf32>
    %10 = arith.mulf %9, %9 : vector<8x32xf32>
    %cst_7 = arith.constant dense<0.000000e+00> : vector<8xf32>
    %11 = vector.multi_reduction <add>, %10, %cst_7 [1] : vector<8x32xf32> to vector<8xf32>
    %12 = vector.shape_cast %11 : vector<8xf32> to vector<8x1xf32>
    %cst_8 = arith.constant 3.200000e+01 : f32
    %13 = vector.broadcast %cst_8 : f32 to vector<8x1xf32>
    %14 = arith.divf %12, %13 : vector<8x1xf32>
    %15 = vector.broadcast %7 : vector<8x1xf32> to vector<8x32xf32>
    %16 = arith.subf %1, %15 : vector<8x32xf32>
    %cst_9 = arith.constant 9.99999974E-6 : f32
    %17 = vector.broadcast %cst_9 : f32 to vector<8x1xf32>
    %18 = arith.addf %14, %17 : vector<8x1xf32>
    %19 = math.rsqrt %18 : vector<8x1xf32>
    %20 = vector.broadcast %19 : vector<8x1xf32> to vector<8x32xf32>
    %21 = arith.mulf %16, %20 : vector<8x32xf32>
    %22 = vector.broadcast %2 : vector<1x32xf32> to vector<8x32xf32>
    %23 = arith.mulf %21, %22 : vector<8x32xf32>
    %24 = vector.broadcast %3 : vector<1x32xf32> to vector<8x32xf32>
    %25 = arith.addf %23, %24 : vector<8x32xf32>
    %c0_10 = arith.constant 0 : index
    %c0_11 = arith.constant 0 : index
    %c0_12 = arith.constant 0 : index
    %26 = vector.load %arg4[%c0_10, %c0_11, %c0_12] : memref<1x8x32xf32, #tpu.memory_space<vmem>>, vector<1x8x32xf32>
    %27 = vector.shape_cast %26 : vector<1x8x32xf32> to vector<8x32xf32>
    %28 = vector.shape_cast %25 : vector<8x32xf32> to vector<1x8x32xf32>
    tpu.vector_store %arg4[%c0_10, %c0_11, %c0_12], %28 {strides = array<i32>} : memref<1x8x32xf32, #tpu.memory_space<vmem>>, vector<1x8x32xf32>,
    return
  }
  func.func @transform_0(%arg0: i32) -> (i32, i32, i32) {
    %c0_i32 = arith.constant 0 : i32
    %c0_i32_0 = arith.constant 0 : i32
    %c0_i32_1 = arith.constant 0 : i32
    return %arg0, %c0_i32, %c0_i32_0 : i32, i32, i32
  }
  func.func @transform_1(%arg0: i32) -> (i32, i32) {
    %c0_i32 = arith.constant 0 : i32
    %c0_i32_0 = arith.constant 0 : i32
    %c0_i32_1 = arith.constant 0 : i32
    return %c0_i32, %c0_i32_0 : i32, i32
  }
  func.func @transform_2(%arg0: i32) -> (i32, i32) {
    %c0_i32 = arith.constant 0 : i32
    %c0_i32_0 = arith.constant 0 : i32
    %c0_i32_1 = arith.constant 0 : i32
    return %c0_i32, %c0_i32_0 : i32, i32
  }
  func.func @transform_3(%arg0: i32) -> (i32, i32, i32) {
    %c0_i32 = arith.constant 0 : i32
    %c0_i32_0 = arith.constant 0 : i32
    %c0_i32_1 = arith.constant 0 : i32
    return %arg0, %c0_i32, %c0_i32_0 : i32, i32, i32
  }
}

</mosaic_0001>

<bundles_post_ra>
// kernel: transformer_forward.5
= control target key start
LH: loop header
LB: loop body
LE: loop exit
PB: predicated region body
PF: predicated region fallthrough
CT: control target
= control target key end

     0   :  { %8 = vsyncpa [#allocation3], 0  ;;  %s519_s0 = inlined_call_operand.vmem [shape: f32[2,8,32], index: 0, kind: input, shape index: {}]   ;;  %s520_s1 = inlined_call_operand.vmem [shape: f32[1,32], index: 1, kind: input, shape index: {}]   ;;  %s521_s2 = inlined_call_operand.vmem [shape: f32[1,32], index: 2, kind: input, shape index: {}]   ;;  %s522_s3 = inlined_call_operand.hbm [shape: f32[2,8,32], index: 3, kind: output, shape index: {}]  }
   0x1   :  { %10 = vsyncpa [#allocation3 + $0x1], 0  ;;  %s410_s12 = smov 0   ;;  %s412_s13 = smov 0  }
   0x2   :  { %s414_s14 = smov 0   ;;  %s416_s15 = smov 0  }
   0x3 LB: > { %s431_s16 = sadd.s32 4294967295, %s387_s15   ;;  %s272_s17 = sadd.s32 4294967294, %s387_s15   ;;  %s387_s15 = sphi %s416_s15, %s528_s15   ;;  %s383_s14 = sphi %s414_s14, %s527_s14   ;;  %s379_s13 = sphi %s412_s13, %s526_s13   ;;  %s375_s12 = sphi %s410_s12, %s525_s12  }
   0x4   : > { %s435_s18 = sadd.s32 1, %s387_s15   ;;  %s91_s19 = sadd.s32 1, %s383_s14 }
   0x5   : > { %s88_s20 = ssub.s32 %s387_s15, %s435_s18  ;;  %p101_p0 = scmp.ne.s32.totalorder %s383_s14, %s379_s13 }
   0x6   : > { %p89_p1 = scmp.eq.s32.totalorder %s88_s20, 0  ;;  %p102_p2 = scmp.eq.s32.totalorder %s431_s16, 1 }
   0x7   : > { %p107_p3 = scmp.ne.s32.totalorder %s379_s13, %s375_s12  ;;  %p108_p4 = scmp.eq.s32.totalorder %s272_s17, 1 }
   0x8   : > { %s446_s21 = scalar_select %p89_p1, %s383_s14, %s91_s19  }
   0x9   : > { %p448_p5 = por %p102_p2, %p101_p0  ;;  %p452_p6 = por %p108_p4, %p107_p3 }
   0xa   : > { %p275_p7 = scmp.ge.s32.totalorder %s387_s15, 1  ;;  %p139_p8 = scmp.lt.s32.totalorder %s387_s15, 3 }
   0xc   : > { %p140_p9 = pnand %p275_p7, %p139_p8 }
   0xd   : > { %p162_p10 = scmp.lt.s32.totalorder (!%p140_p9), %s431_s16, 1  ;;  %vm169_vm0 = vcmask (!%p140_p9), 261120   ;;  %s159_s29 = sand.u32 (!%p140_p9), 1, %s379_s13   ;;  %v278_v11 = vld [vmem:[%s520_s1] ss:$0 sm:$0xff] (!%p140_p9) }
   0xe   : > { %143 = sbr.rel (%p140_p9) target bundleno = 353 (0x161), region = 32  ;;  %s276_s30 = sshll.u32 (!%p140_p9), %s159_s29, 3  ;;  %v279_v13 = vld [vmem:[%s521_s2] ss:$0 sm:$0xff] (!%p140_p9) }
   0xf   : > { %s281_s8 = sshll.u32 (!%p140_p9), %s431_s16, 7  ;;  %s161_s9 = scalar_lea.vmem (!%p140_p9), [#allocation2], %s276_s30 }
  0x10   : > { %s213_s10 = sshll.u32 (!%p140_p9), %s161_s9, 4  ;;  %s476_s19 = scalar_lea.hbm (!%p140_p9), %s522_s3, %s281_s8  ;;  %s478_s10 = int_to_ptr.vmem [resolvable:$true] %s213_s10 }
  0x11   : > { %s200_s20 = scalar_lea.sflag (!%p140_p9), [#allocation3], %s159_s29 }
  0x15   : > { %s163_s24 = scalar_select %p162_p10, %s431_s16, 1 }
  0x16   : > { %s389_s16 = smov [#allocation2]  }
  0x17   : > { %s277_s25 = sshll.u32 %s163_s24, 3  ;;  %s325_s24 = scalar_lea.vmem %s478_s10, 128 }
  0x18   : > { %s165_s28 = scalar_lea.vmem %s519_s0, %s277_s25  ;;  %p326_p11 = scmp.ne.s32.totalorder %s478_s10, %s325_s24 }
  0x19   : > { %v166_v0 = vld [vmem:[%s165_s28] sm:$0xff]  ;;  %s329_s25 = sshll.u32 %s389_s16, 4  ;;  %s330_s25 = int_to_ptr.vmem [resolvable:$false] %s329_s25 }
  0x1a   : > { %v170_v1 = vsel %vm169_vm0, %v166_v0, 0.0  ;;  %p327_p12 = pnand %p326_p11, %p448_p5  ;;  %s331_s26 = scalar_lea.vmem %s330_s25, 256 }
  0x1b   : > { %171 = vadd.xlane.f32.xlu0 %v170_v1  ;;  %p332_p0 = scmp.lt.s32.totalorder %s478_s10, %s330_s25  ;;  %p333_p1 = scmp.lt.s32.totalorder %s331_s26, %s325_s24 }
  0x1c   : > { %p328_p13 = pneg %p327_p12 }
  0x1d   : > { %p334_p2 = por %p333_p1, %p332_p0 }
  0x1f   : > { %p335_p3 = pnand %p334_p2, %p328_p13 }
  0xa8   : > { %v172_v2 = vpop.xlane.xlu0 %171 }
  0xa9   : > { %v174_v3 = vmul.f32 0.03125, %v172_v2 }
  0xab   : > { %v175_v4 = vsub.f32 %v166_v0, %v174_v3 }
  0xad   : > { %v176_v5 = vmul.f32 %v175_v4, %v175_v4 }
  0xaf   : > { %v177_v6 = vsel %vm169_vm0, %v176_v5, 0.0 }
  0xb0   : > { %178 = vadd.xlane.f32.xlu0 %v177_v6 }
 0x13d   : > { %v179_v7 = vpop.xlane.xlu0 %178 }
 0x13e   : > { %v180_v8 = vmul.f32 0.03125, %v179_v7 }
 0x140   : > { %v181_v9 = vadd.f32 1e-05, %v180_v8 }
 0x142   : > { %323 = vrsqrt.f32 %v181_v9 }
 0x14c   : > { %v324_v10 = vpop.eup %323 }
 0x14d   : > { %v183_v12 = vmul.f32 %v324_v10, %v175_v4 }
 0x14f   : > { %v190_v14 = vmul.f32 %v278_v11, %v183_v12 }
 0x151   : > { %v197_v15 = vadd.f32 %v279_v13, %v190_v14 }
 0x153   : > { %198 = vst.msk [vmem:[%s161_s9] sm:$0xff] %vm169_vm0, %v197_v15 }
 0x154   : > { %338 = shalt.err (!%p335_p3)
}
 0x155   : > { %s339_s27 = scalar_lea.hbm %s476_s19, 128  ;;  %s343_s30 = scalar_lea.hbm %s522_s3, 256 }
 0x156   : > { %p340_p4 = scmp.ne.s32.totalorder %s476_s19, %s339_s27  ;;  %p344_p9 = scmp.lt.u32.totalorder %s476_s19, %s522_s3 }
 0x157   : > { %p345_p10 = scmp.lt.u32.totalorder %s343_s30, %s339_s27  ;;  %p347_p12 = scmp.lt.u32.totalorder %s339_s27, %s476_s19 }
 0x158   : > { %p341_p7 = pnand %p340_p4, %p448_p5 }
 0x159   : > { %p346_p11 = por %p345_p10, %p344_p9 }
 0x15a   : > { %p342_p8 = pneg %p341_p7 }
 0x15b   : > { %p348_p13 = por %p347_p12, %p346_p11 }
 0x15d   : > { %p349_p0 = pnand %p348_p13, %p342_p8 }
 0x15f   : > { %352 = shalt.err (!%p349_p0)
}
 0x160   : > { %284 = dma.vmem_to_hbm [thread:$0]  (%p448_p5), %s478_s10, 128, %s476_s19, %s200_s20  }
 0x161 PF: > { %p290_p1 = scmp.ge.s32.totalorder %s387_s15, 2  ;;  %s225_s6 = sand.u32 1, %s375_s12  }
 0x162   : > { %s226_s7 = scalar_lea.sflag [#allocation3], %s225_s6 }
 0x163   : > { %p287_p2 = pnand %p290_p1, %p452_p6 }
 0x165   : > { %370 = dma.done.wait (!%p287_p2), %s226_s7, 128  }
 0x166   : > { %372 = vsyncadd (!%p287_p2), %s226_s7, 4294967168  ;;  %p13_p3 = scmp.ge.s32.totalorder %s435_s18, 4   ;;  %s525_s12 = smov %s379_s13 }
 0x167   : > { %s526_s13 = smov %s383_s14  ;;  %s527_s14 = smov %s446_s21 }
 0x168   : > { %s528_s15 = smov %s435_s18  ;;  %15 = sbr.rel (!%p13_p3) target bundleno = 3 (0x3), region = 67 }
 0x16f   :  { %231 = vsyncpa [#allocation3], 1 }
 0x170   :  { %233 = vsyncpa [#allocation3 + $0x1], 1 }

// kernel: transformer_forward.3
= control target key start
LH: loop header
LB: loop body
LE: loop exit
PB: predicated region body
PF: predicated region fallthrough
CT: control target
= control target key end

     0   :  { %s2488_s25 = smov 0   ;;  %s2807_s0 = inlined_call_operand.vmem [shape: f32[2,8,32], index: 0, kind: input, shape index: {}]   ;;  %s2808_s1 = inlined_call_operand.vmem [shape: f32[1,32], index: 1, kind: input, shape index: {}]   ;;  %s2809_s2 = inlined_call_operand.vmem [shape: f32[1,32], index: 2, kind: input, shape index: {}]   ;;  %s2810_s3 = inlined_call_operand.vmem [shape: bf16[4,32,8], index: 3, kind: input, shape index: {}]   ;;  %s2811_s4 = inlined_call_operand.vmem [shape: bf16[4,32,8], index: 4, kind: input, shape index: {}]   ;;  %s2812_s5 = inlined_call_operand.vmem [shape: bf16[4,32,8], index: 5, kind: input, shape index: {}]   ;;  %s2813_s6 = inlined_call_operand.vmem [shape: bf16[4,8,32], index: 6, kind: input, shape index: {}]   ;;  %s2814_s7 = inlined_call_operand.vmem [shape: f32[1,32], index: 7, kind: input, shape index: {}]   ;;  %s2815_s8 = inlined_call_operand.vmem [shape: f32[1,32], index: 8, kind: input, shape index: {}]   ;;  %s2816_s9 = inlined_call_operand.vmem [shape: bf16[32,64], index: 9, kind: input, shape index: {}]   ;;  %s2817_s10 = inlined_call_operand.vmem [shape: f32[1,64], index: 10, kind: input, shape index: {}]   ;;  %s2818_s11 = inlined_call_operand.vmem [shape: bf16[64,32], index: 11, kind: input, shape index: {}]   ;;  %s2819_s12 = inlined_call_operand.vmem [shape: f32[1,32], index: 12, kind: input, shape index: {}]   ;;  %s2820_s13 = inlined_call_operand.vmem [shape: f32[2,8,32], index: 13, kind: output, shape index: {}]  }
   0x1 LB: > { %s2019_s26 = sadd.s32 4294967295, %s2414_s25   ;;  %p2023_p0 = scmp.ge.s32.totalorder %s2414_s25, 1  ;;  %s2414_s25 = sphi %s2488_s25, %s23_s25  }
   0x2   : > { %p386_p1 = scmp.lt.s32.totalorder %s2414_s25, 3 }
   0x4   : > { %p387_p2 = pnand %p2023_p0, %p386_p1 }
   0x5   : > { %p428_p3 = scmp.lt.s32.totalorder (!%p387_p2), %s2019_s26, 1  ;;  %vm440_vm0 = vcmask (!%p387_p2), 261120   ;;  %v2356_v7 = vld [vmem:[%s2810_s3] sm:$0xff] (!%p387_p2)   ;;  %v2357_v8 = vld [vmem:[%s2810_s3 + $0x10] sm:$0xff] (!%p387_p2)   ;;  %v2416_v9 = vmov (!%p387_p2), 0.0   ;;  %v2358_v10 = vld [vmem:[%s2810_s3 + $0x8] sm:$0xff] (!%p387_p2)  }
   0x6   : > { %390 = sbr.rel (%p387_p2) target bundleno = 2306 (0x902), region = 72  ;;  %2158 = vmatprep.subr.bf16.mxu0 (!%p387_p2), %v2416_v9  ;;  %2166 = vmatprep.subr.bf16.mxu1 (!%p387_p2), %v2416_v9  ;;  %v2359_v11 = vld [vmem:[%s2810_s3 + $0x18] sm:$0xff] (!%p387_p2)   ;;  %vm2417_vm1 = vmmov (!%p387_p2), 0   ;;  %v2026_v16 = vld [vmem:[%s2808_s1] ss:$0 sm:$0xff] (!%p387_p2)  ;;  %v2361_v22 = vld [vmem:[%s2810_s3 + $0x30] sm:$0xff] (!%p387_p2)  }
   0x7   : > { %2159 = vmatpush3.bf16.msra.mxu0 (!%p387_p2), %v2356_v7  ;;  %2167 = vmatpush3.bf16.msra.mxu1 (!%p387_p2), %v2357_v8  ;;  %v2027_v18 = vld [vmem:[%s2809_s2] ss:$0 sm:$0xff] (!%p387_p2)  ;;  %v2362_v24 = vld [vmem:[%s2810_s3 + $0x28] sm:$0xff] (!%p387_p2)   ;;  %v2363_v25 = vld [vmem:[%s2810_s3 + $0x38] sm:$0xff] (!%p387_p2)   ;;  %vm1157_vm2 = vcmask (!%p387_p2), 64512   ;;  %vm1397_vm3 = vcmask (!%p387_p2), 1043456  }
   0x8   : > { %2160 = vmatprep.subr.bf16.mxu0 (!%p387_p2), %v2416_v9  ;;  %2168 = vmatprep.subr.bf16.mxu1 (!%p387_p2), %v2416_v9  ;;  %v2360_v21 = vld [vmem:[%s2810_s3 + $0x20] sm:$0xff] (!%p387_p2)   ;;  %v2365_v27 = vld [vmem:[%s2811_s4 + $0x10] sm:$0xff] (!%p387_p2)   ;;  %v2366_v28 = vld [vmem:[%s2811_s4 + $0x8] sm:$0xff] (!%p387_p2)   ;;  %vm1920_vm4 = vcmask (!%p387_p2), 523264  }
   0x9   : > { %2162 = vmatprep.mubr.msk.bf16.mxu0 (!%p387_p2), %vm2417_vm1, %v2416_v9  ;;  %2170 = vmatprep.mubr.msk.bf16.mxu1 (!%p387_p2), %vm2417_vm1, %v2416_v9  ;;  %v2364_v26 = vld [vmem:[%s2811_s4] sm:$0xff] (!%p387_p2)   ;;  %v2367_v29 = vld [vmem:[%s2811_s4 + $0x18] sm:$0xff] (!%p387_p2)   ;;  %v2369_v31 = vld [vmem:[%s2811_s4 + $0x30] sm:$0xff] (!%p387_p2)  }
   0xa   : > { %v2368_v30 = vld [vmem:[%s2811_s4 + $0x20] sm:$0xff] (!%p387_p2)   ;;  %v2370_v32 = vld [vmem:[%s2811_s4 + $0x28] sm:$0xff] (!%p387_p2)   ;;  %v2371_v33 = vld [vmem:[%s2811_s4 + $0x38] sm:$0xff] (!%p387_p2)  }
   0xb   : > { %2161 = vmatpush3.bf16.msra.mxu0 (!%p387_p2), %v2358_v10  ;;  %2169 = vmatpush3.bf16.msra.mxu1 (!%p387_p2), %v2359_v11  ;;  %v2372_v34 = vld [vmem:[%s2812_s5] sm:$0xff] (!%p387_p2)   ;;  %v2373_v35 = vld [vmem:[%s2812_s5 + $0x10] sm:$0xff] (!%p387_p2)   ;;  %v2374_v36 = vld [vmem:[%s2812_s5 + $0x8] sm:$0xff] (!%p387_p2)  }
   0xc   : > { %2174 = vmatprep.subr.bf16.mxu0 (!%p387_p2), %v2416_v9  ;;  %2182 = vmatprep.subr.bf16.mxu1 (!%p387_p2), %v2416_v9  ;;  %v2375_v37 = vld [vmem:[%s2812_s5 + $0x18] sm:$0xff] (!%p387_p2)   ;;  %v2376_v38 = vld [vmem:[%s2812_s5 + $0x20] sm:$0xff] (!%p387_p2)   ;;  %v2377_v39 = vld [vmem:[%s2812_s5 + $0x30] sm:$0xff] (!%p387_p2)  }
   0xd   : > { %s2822_s26 = smov (!%p428_p3, %s2019_s26), 1  ;;  %v2378_v40 = vld [vmem:[%s2812_s5 + $0x28] sm:$0xff]   ;;  %v2379_v41 = vld [vmem:[%s2812_s5 + $0x38] sm:$0xff]  }
   0xe   : > { %s2024_s27 = sshll.u32 %s2822_s26, 3 }
   0xf   : > { %s431_s30 = scalar_lea.vmem %s2807_s0, %s2024_s27  ;;  %s435_s29 = scalar_lea.vmem %s2820_s13, %s2024_s27 }
  0x10   : > { %v2504_v0 = vld [vmem:[%s431_s30] sm:$0xff] }
  0x11   : > { %v441_v1 = vsel %vm440_vm0, %v2504_v0, 0.0 }
  0x12   : > { %442 = vadd.xlane.f32.xlu0 %v441_v1 }
  0x9f   : > { %v443_v2 = vpop.xlane.xlu0 %442 }
  0xa0   : > { %v445_v3 = vmul.f32 0.03125, %v443_v2 }
  0xa2   : > { %v446_v4 = vsub.f32 %v2504_v0, %v445_v3 }
  0xa4   : > { %v447_v5 = vmul.f32 %v446_v4, %v446_v4 }
  0xa6   : > { %v448_v6 = vsel %vm440_vm0, %v447_v5, 0.0 }
  0xa7   : > { %449 = vadd.xlane.f32.xlu0 %v448_v6 }
 0x134   : > { %v450_v12 = vpop.xlane.xlu0 %449 }
 0x135   : > { %v451_v13 = vmul.f32 0.03125, %v450_v12 }
 0x137   : > { %v452_v14 = vadd.f32 1e-05, %v451_v13 }
 0x139   : > { %2386 = vrsqrt.f32 %v452_v14 }
 0x143   : > { %v2387_v15 = vpop.eup %2386 }
 0x144   : > { %v454_v17 = vmul.f32 %v2387_v15, %v446_v4 }
 0x146   : > { %v461_v19 = vmul.f32 %v2026_v16, %v454_v17 }
 0x148   : > { %v468_v20 = vadd.f32 %v2027_v18, %v461_v19 }
 0x14a   : > { %v2544_v23 = vpack.c.bf16 %v468_v20, %v468_v20 }
 0x14c   : > { %2163 = vmatmul.mubr.msk.bf16.vlgmr.msra.gmra.mrb[0].mxu0 %vm440_vm0, %v2544_v23  ;;  %2171 = vmatmul.mubr.msk.bf16.vlgmr.msra.gmra.mrb[0].mxu1 %vm440_vm0, %v2544_v23 }
 0x14d   : > { %2175 = vmatpush3.bf16.msra.mxu0 %v2360_v21  ;;  %2183 = vmatpush3.bf16.msra.mxu1 %v2361_v22 }
 0x14e   : > { %2176 = vmatprep.subr.bf16.mxu0 %v2416_v9  ;;  %2184 = vmatprep.subr.bf16.mxu1 %v2416_v9 }
 0x14f   : > { %2178 = vmatprep.mubr.msk.bf16.mxu0 %vm2417_vm1, %v2416_v9  ;;  %2186 = vmatprep.mubr.msk.bf16.mxu1 %vm2417_vm1, %v2416_v9 }
 0x151   : > { %2177 = vmatpush3.bf16.msra.mxu0 %v2362_v24  ;;  %2185 = vmatpush3.bf16.msra.mxu1 %v2363_v25 }
 0x152   : > { %2190 = vmatprep.subr.bf16.mxu0 %v2416_v9  ;;  %2198 = vmatprep.subr.bf16.mxu1 %v2416_v9 }
 0x154   : > { %2179 = vmatmul.mubr.msk.bf16.vlgmr.msra.gmra.mrb[4].mxu0 %vm440_vm0, %v2544_v23  ;;  %2187 = vmatmul.mubr.msk.bf16.vlgmr.msra.gmra.mrb[4].mxu1 %vm440_vm0, %v2544_v23 }
 0x155   : > { %2191 = vmatpush3.bf16.msra.mxu0 %v2364_v26  ;;  %2199 = vmatpush3.bf16.msra.mxu1 %v2365_v27 }
 0x156   : > { %2192 = vmatprep.subr.bf16.mxu0 %v2416_v9  ;;  %2200 = vmatprep.subr.bf16.mxu1 %v2416_v9 }
 0x157   : > { %2194 = vmatprep.mubr.msk.bf16.mxu0 %vm2417_vm1, %v2416_v9  ;;  %2202 = vmatprep.mubr.msk.bf16.mxu1 %vm2417_vm1, %v2416_v9 }
 0x159   : > { %2193 = vmatpush3.bf16.msra.mxu0 %v2366_v28  ;;  %2201 = vmatpush3.bf16.msra.mxu1 %v2367_v29 }
 0x15a   : > { %2206 = vmatprep.subr.bf16.mxu0 %v2416_v9  ;;  %2214 = vmatprep.subr.bf16.mxu1 %v2416_v9 }
 0x15c   : > { %2195 = vmatmul.mubr.msk.bf16.vlgmr.msra.gmra.mrb[8].mxu0 %vm440_vm0, %v2544_v23  ;;  %2203 = vmatmul.mubr.msk.bf16.vlgmr.msra.gmra.mrb[8].mxu1 %vm440_vm0, %v2544_v23 }
 0x15d   : > { %2207 = vmatpush3.bf16.msra.mxu0 %v2368_v30  ;;  %2215 = vmatpush3.bf16.msra.mxu1 %v2369_v31 }
 0x15e   : > { %2208 = vmatprep.subr.bf16.mxu0 %v2416_v9  ;;  %2216 = vmatprep.subr.bf16.mxu1 %v2416_v9 }
 0x15f   : > { %2210 = vmatprep.mubr.msk.bf16.mxu0 %vm2417_vm1, %v2416_v9  ;;  %2218 = vmatprep.mubr.msk.bf16.mxu1 %vm2417_vm1, %v2416_v9 }
 0x161   : > { %2209 = vmatpush3.bf16.msra.mxu0 %v2370_v32  ;;  %2217 = vmatpush3.bf16.msra.mxu1 %v2371_v33 }
 0x162   : > { %2222 = vmatprep.subr.bf16.mxu0 %v2416_v9  ;;  %2230 = vmatprep.subr.bf16.mxu1 %v2416_v9 }
 0x164   : > { %2211 = vmatmul.mubr.msk.bf16.vlgmr.msra.gmra.mrb[12].mxu0 %vm440_vm0, %v2544_v23  ;;  %2219 = vmatmul.mubr.msk.bf16.vlgmr.msra.gmra.mrb[12].mxu1 %vm440_vm0, %v2544_v23 }
 0x165   : > { %2223 = vmatpush3.bf16.msra.mxu0 %v2372_v34  ;;  %2231 = vmatpush3.bf16.msra.mxu1 %v2373_v35 }
 0x166   : > { %2224 = vmatprep.subr.bf16.mxu0 %v2416_v9  ;;  %2232 = vmatprep.subr.bf16.mxu1 %v2416_v9 }
 0x167   : > { %2226 = vmatprep.mubr.msk.bf16.mxu0 %vm2417_vm1, %v2416_v9  ;;  %2234 = vmatprep.mubr.msk.bf16.mxu1 %vm2417_vm1, %v2416_v9 }
 0x169   : > { %2225 = vmatpush3.bf16.msra.mxu0 %v2374_v36  ;;  %2233 = vmatpush3.bf16.msra.mxu1 %v2375_v37 }
 0x16a   : > { %2238 = vmatprep.subr.bf16.mxu0 %v2416_v9  ;;  %2246 = vmatprep.subr.bf16.mxu1 %v2416_v9 }
 0x16c   : > { %2227 = vmatmul.mubr.msk.bf16.vlgmr.msra.gmra.mrb[16].mxu0 %vm440_vm0, %v2544_v23  ;;  %2235 = vmatmul.mubr.msk.bf16.vlgmr.msra.gmra.mrb[16].mxu1 %vm440_vm0, %v2544_v23 }
 0x16d   : > { %2239 = vmatpush3.bf16.msra.mxu0 %v2376_v38  ;;  %2247 = vmatpush3.bf16.msra.mxu1 %v2377_v39 }
 0x16e   : > { %2240 = vmatprep.subr.bf16.mxu0 %v2416_v9  ;;  %2248 = vmatprep.subr.bf16.mxu1 %v2416_v9 }
 0x16f   : > { %2242 = vmatprep.mubr.msk.bf16.mxu0 %vm2417_vm1, %v2416_v9  ;;  %2250 = vmatprep.mubr.msk.bf16.mxu1 %vm2417_vm1, %v2416_v9 }
 0x171   : > { %2241 = vmatpush3.bf16.msra.mxu0 %v2378_v40  ;;  %2249 = vmatpush3.bf16.msra.mxu1 %v2379_v41 }
 0x172   : > { %2254 = vmatprep.subr.bf16.mxu0 %v2416_v9  ;;  %2260 = vmatprep.subr.bf16.mxu1 %v2416_v9 }
 0x174   : > { %2243 = vmatmul.mubr.msk.bf16.vlgmr.msra.gmra.mrb[20].mxu0 %vm440_vm0, %v2544_v23  ;;  %2251 = vmatmul.mubr.msk.bf16.vlgmr.msra.gmra.mrb[20].mxu1 %vm440_vm0, %v2544_v23 }
 0x175   : > { %2256 = vmatprep.mubr.msk.bf16.mxu0 %vm2417_vm1, %v2416_v9  ;;  %2262 = vmatprep.mubr.msk.bf16.mxu1 %vm2417_vm1, %v2416_v9 }
 0x21f   : > { %v535_v42 = vpop.f32.mrb[0].mxu0  ;;  %v587_v43 = vpop.f32.mrb[0].mxu1 }
 0x220   : > { %v2164_v44 = vpop.f32.mrb[1].mxu0  ;;  %v2172_v45 = vpop.f32.mrb[1].mxu1  ;;  %v1145_v7 = vmul.f32 0.35355338, %v535_v42  ;;  %v1146_v8 = vmul.f32 0.35355338, %v587_v43 }
 0x221   : > { %v538_v46 = vpop.f32.mrb[2].mxu0  ;;  %v590_v47 = vpop.f32.mrb[2].mxu1 }
 0x222   : > { %v2165_v48 = vpop.f32.mrb[3].mxu0  ;;  %v2173_v49 = vpop.f32.mrb[3].mxu1  ;;  %v1149_v12 = vpack.c.bf16 %v1145_v7, %v1145_v7  ;;  %v1150_v13 = vpack.c.bf16 %v1146_v8, %v1146_v8 }
 0x227   : > { %v639_v50 = vpop.f32.mrb[4].mxu0  ;;  %v691_v51 = vpop.f32.mrb[4].mxu1 }
 0x228   : > { %v2180_v52 = vpop.f32.mrb[5].mxu0  ;;  %v2188_v53 = vpop.f32.mrb[5].mxu1  ;;  %v1147_v24 = vmul.f32 0.35355338, %v639_v50  ;;  %v1148_v25 = vmul.f32 0.35355338, %v691_v51 }
 0x229   : > { %v642_v54 = vpop.f32.mrb[6].mxu0  ;;  %v694_v55 = vpop.f32.mrb[6].mxu1 }
 0x22a   : > { %v2181_v56 = vpop.f32.mrb[7].mxu0  ;;  %v2189_v57 = vpop.f32.mrb[7].mxu1  ;;  %v1151_v28 = vpack.c.bf16 %v1147_v24, %v1147_v24  ;;  %v1152_v29 = vpack.c.bf16 %v1148_v25, %v1148_v25 }
 0x22f   : > { %v759_v58 = vpop.f32.mrb[8].mxu0  ;;  %v811_v59 = vpop.f32.mrb[8].mxu1 }
 0x230   : > { %v1153_v60 = vpack.c.bf16 %v759_v58, %v759_v58  ;;  %v1154_v61 = vpack.c.bf16 %v811_v59, %v811_v59  ;;  %v2196_v62 = vpop.f32.mrb[9].mxu0  ;;  %v2204_v63 = vpop.f32.mrb[9].mxu1 }
 0x231   : > { %v762_v1 = vpop.f32.mrb[10].mxu0  ;;  %v814_v2 = vpop.f32.mrb[10].mxu1 }
 0x232   : > { %v1162_v3 = vsel %vm1157_vm2, %v1153_v60, 0  ;;  %v1208_v4 = vsel %vm1157_vm2, %v1154_v61, 0  ;;  %v2197_v5 = vpop.f32.mrb[11].mxu0  ;;  %v2205_v6 = vpop.f32.mrb[11].mxu1 }
 0x233   : > { %2255 = vmatpush3.bf16.xpose.msra.mxu0 %v1162_v3  ;;  %2261 = vmatpush3.bf16.xpose.msra.mxu1 %v1208_v4 }
 0x234   : > { %2266 = vmatprep.subr.bf16.mxu0 %v2416_v9  ;;  %2272 = vmatprep.subr.bf16.mxu1 %v2416_v9 }
 0x237   : > { %v863_v10 = vpop.f32.mrb[12].mxu0  ;;  %v915_v11 = vpop.f32.mrb[12].mxu1 }
 0x238   : > { %v1155_v14 = vpack.c.bf16 %v863_v10, %v863_v10  ;;  %v1156_v15 = vpack.c.bf16 %v915_v11, %v915_v11  ;;  %v2212_v16 = vpop.f32.mrb[13].mxu0  ;;  %v2220_v17 = vpop.f32.mrb[13].mxu1 }
 0x239   : > { %v866_v18 = vpop.f32.mrb[14].mxu0  ;;  %v918_v19 = vpop.f32.mrb[14].mxu1 }
 0x23a   : > { %v1254_v20 = vsel %vm1157_vm2, %v1155_v14, 0  ;;  %v1300_v21 = vsel %vm1157_vm2, %v1156_v15, 0  ;;  %v2213_v22 = vpop.f32.mrb[15].mxu0  ;;  %v2221_v23 = vpop.f32.mrb[15].mxu1  ;;  %2257 = vmatmul.mubr.msk.bf16.vlgmr.msra.gmra.mrb[24].mxu0 %vm1157_vm2, %v1149_v12  ;;  %2263 = vmatmul.mubr.msk.bf16.vlgmr.msra.gmra.mrb[24].mxu1 %vm1157_vm2, %v1150_v13 }
 0x23b   : > { %2267 = vmatpush3.bf16.xpose.msra.mxu0 %v1254_v20  ;;  %2273 = vmatpush3.bf16.xpose.msra.mxu1 %v1300_v21 }
 0x23c   : > { %2268 = vmatprep.mubr.msk.bf16.mxu0 %vm2417_vm1, %v2416_v9  ;;  %2274 = vmatprep.mubr.msk.bf16.mxu1 %vm2417_vm1, %v2416_v9 }
 0x23d   : > { %2278 = vmatprep.subr.bf16.mxu0 %v2416_v9  ;;  %2284 = vmatprep.subr.bf16.mxu1 %v2416_v9 }
 0x23f   : > { %v983_v26 = vpop.f32.mrb[16].mxu0  ;;  %v1035_v27 = vpop.f32.mrb[16].mxu1 }
 0x240   : > { %v1390_v30 = vpack.c.bf16 %v983_v26, %v983_v26  ;;  %v1391_v31 = vpack.c.bf16 %v1035_v27, %v1035_v27  ;;  %v2228_v32 = vpop.f32.mrb[17].mxu0  ;;  %v2236_v33 = vpop.f32.mrb[17].mxu1 }
 0x241   : > { %v986_v34 = vpop.f32.mrb[18].mxu0  ;;  %v1038_v35 = vpop.f32.mrb[18].mxu1 }
 0x242   : > { %v1399_v36 = vsel %vm1397_vm3, %v1390_v30, 0  ;;  %v1445_v37 = vsel %vm1397_vm3, %v1391_v31, 0  ;;  %v2229_v38 = vpop.f32.mrb[19].mxu0  ;;  %v2237_v39 = vpop.f32.mrb[19].mxu1  ;;  %2269 = vmatmul.mubr.msk.bf16.vlgmr.msra.gmra.mrb[28].mxu0 %vm1157_vm2, %v1151_v28  ;;  %2275 = vmatmul.mubr.msk.bf16.vlgmr.msra.gmra.mrb[28].mxu1 %vm1157_vm2, %v1152_v29 }
 0x243   : > { %2279 = vmatpush3.bf16.msra.mxu0 %v1399_v36  ;;  %2285 = vmatpush3.bf16.msra.mxu1 %v1445_v37 }
 0x244   : > { %2280 = vmatprep.mubr.msk.bf16.mxu0 %vm2417_vm1, %v2416_v9  ;;  %2290 = vmatprep.subr.bf16.mxu0 %v2416_v9 }
 0x245   : > { %2286 = vmatprep.mubr.msk.bf16.mxu1 %vm2417_vm1, %v2416_v9  ;;  %2296 = vmatprep.subr.bf16.mxu1 %v2416_v9 }
 0x247   : > { %v2692_v40 = vpop.f32.mrb[20].mxu0  ;;  %v2694_v41 = vpop.f32.mrb[20].mxu1 }
 0x248   : > { %v2244_v42 = vpop.f32.mrb[21].mxu0  ;;  %v2252_v43 = vpop.f32.mrb[21].mxu1  ;;  %v1392_v31 = vpack.c.bf16 %v2692_v40, %v2692_v40  ;;  %v1393_v36 = vpack.c.bf16 %v2694_v41, %v2694_v41  ;;  %v1583_v41 = vld [vmem:[%s2813_s6] sm:$0xf] }
 0x249   : > { %v1090_v44 = vpop.f32.mrb[22].mxu0  ;;  %v1142_v45 = vpop.f32.mrb[22].mxu1 }
 0x24a   : > { %v2245_v46 = vpop.f32.mrb[23].mxu0  ;;  %v2253_v47 = vpop.f32.mrb[23].mxu1  ;;  %v1491_v35 = vsel %vm1397_vm3, %v1392_v31, 0  ;;  %v1537_v42 = vsel %vm1397_vm3, %v1393_v36, 0 }
 0x24b   : > { %v1591_v46 = vsel %vm1397_vm3, %v1583_v41, 0  ;;  %v2380_v41 = vld [vmem:[%s2816_s9] sm:$0xff]  }
 0x30d   : > { %v1198_v48 = vpop.f32.mrb[24].mxu0  ;;  %v1244_v49 = vpop.f32.mrb[24].mxu1 }
 0x30e   : > { %v2258_v50 = vpop.f32.mrb[25].mxu0  ;;  %v2264_v51 = vpop.f32.mrb[25].mxu1  ;;  %v1342_v52 = vsel %vm1157_vm2, %v1198_v48, -inf  ;;  %v1345_v57 = vsel %vm1157_vm2, %v1244_v49, -inf }
 0x30f   : > { %v1247_v53 = vpop.f32.mrb[26].mxu1  ;;  %1343 = vmax.xlane.f32.xlu1 %v1342_v52  ;;  %v1201_v54 = vpop.f32.mrb[26].mxu0  ;;  %v1585_v50 = vld [vmem:[%s2813_s6 + $0x8] sm:$0xf] }
 0x310   : > { %v2259_v55 = vpop.f32.mrb[27].mxu0  ;;  %v2265_v56 = vpop.f32.mrb[27].mxu1  ;;  %v1683_v54 = vsel %vm1397_vm3, %v1585_v50, 0 }
 0x311   : > { %v1586_v56 = vld [vmem:[%s2813_s6 + $0xc] sm:$0xf] }
 0x313   : > { %1346 = vmax.xlane.f32.xlu1 %v1345_v57 }
 0x315   : > { %v1290_v58 = vpop.f32.mrb[28].mxu0  ;;  %v1336_v59 = vpop.f32.mrb[28].mxu1 }
 0x316   : > { %v2270_v60 = vpop.f32.mrb[29].mxu0  ;;  %v2276_v61 = vpop.f32.mrb[29].mxu1  ;;  %v1351_v62 = vsel %vm1157_vm2, %v1336_v59, -inf  ;;  %v1348_v63 = vsel %vm1157_vm2, %v1290_v58, -inf }
 0x317   : > { %v1339_v1 = vpop.f32.mrb[30].mxu1  ;;  %1352 = vmax.xlane.f32.xlu1 %v1351_v62  ;;  %1349 = vmax.xlane.f32.xlu0 %v1348_v63  ;;  %v1293_v2 = vpop.f32.mrb[30].mxu0  ;;  %v1729_v61 = vsel %vm1397_vm3, %v1586_v56, 0  ;;  %v2385_v56 = vld [vmem:[%s2818_s11 + $0x18] sm:$0xff]  }
 0x318   : > { %v2271_v3 = vpop.f32.mrb[31].mxu0  ;;  %v2277_v4 = vpop.f32.mrb[31].mxu1 }
 0x39c   : > { %v1344_v5 = vpop.xlane.xlu1 %1343 }
 0x39d   : > { %v1354_v6 = vsub.f32 %v1198_v48, %v1344_v5  ;;  %v1584_v48 = vld [vmem:[%s2813_s6 + $0x4] sm:$0xf] }
 0x39f   : > { %v1358_v7 = vmul.f32 1.442695, %v1354_v6 }
 0x3a0   : > { %v1347_v8 = vpop.xlane.xlu1 %1346 }
 0x3a1   : > { %2388 = vpow2.f32 %v1358_v7  ;;  %v1355_v10 = vsub.f32 %v1244_v49, %v1347_v8  ;;  %v1637_v49 = vsel %vm1397_vm3, %v1584_v48, 0 }
 0x3a3   : > { %v1360_v11 = vmul.f32 1.442695, %v1355_v10 }
 0x3a4   : > { %v1353_v12 = vpop.xlane.xlu1 %1352  ;;  %v1350_v13 = vpop.xlane.xlu0 %1349 }
 0x3a5   : > { %2390 = vpow2.f32 %v1360_v11  ;;  %v1357_v14 = vsub.f32 %v1336_v59, %v1353_v12  ;;  %v1356_v15 = vsub.f32 %v1290_v58, %v1350_v13 }
 0x3a7   : > { %v1364_v16 = vmul.f32 1.442695, %v1357_v14  ;;  %v1362_v17 = vmul.f32 1.442695, %v1356_v15 }
 0x3a9   : > { %2392 = vpow2.f32 %v1364_v16 }
 0x3aa   : > { %2394 = vpow2.f32 %v1362_v17 }
 0x3ab   : > { %v2389_v18 = vpop.eup %2388 }
 0x3ac   : > { %v1366_v19 = vsel %vm1157_vm2, %v2389_v18, 0.0 }
 0x3ad   : > { %1367 = vadd.xlane.f32.xlu0 %v1366_v19 }
 0x3af   : > { %v2391_v20 = vpop.eup %2390 }
 0x3b0   : > { %v1369_v21 = vsel %vm1157_vm2, %v2391_v20, 0.0 }
 0x3b1   : > { %1370 = vadd.xlane.f32.xlu1 %v1369_v21 }
 0x3b3   : > { %v2393_v22 = vpop.eup %2392 }
 0x3b4   : > { %v2395_v23 = vpop.eup %2394  ;;  %v1375_v24 = vsel %vm1157_vm2, %v2393_v22, 0.0 }
 0x3b5   : > { %1376 = vadd.xlane.f32.xlu1 %v1375_v24  ;;  %v1372_v25 = vsel %vm1157_vm2, %v2395_v23, 0.0 }
 0x3b6   : > { %1373 = vadd.xlane.f32.xlu0 %v1372_v25 }
 0x43a   : > { %v1368_v26 = vpop.xlane.xlu0 %1367 }
 0x43b   : > { %2396 = vrcp.f32 %v1368_v26 }
 0x43e   : > { %v1371_v27 = vpop.xlane.xlu1 %1370 }
 0x43f   : > { %2398 = vrcp.f32 %v1371_v27 }
 0x442   : > { %v1377_v28 = vpop.xlane.xlu1 %1376 }
 0x443   : > { %2400 = vrcp.f32 %v1377_v28  ;;  %v1374_v29 = vpop.xlane.xlu0 %1373 }
 0x444   : > { %2402 = vrcp.f32 %v1374_v29 }
 0x445   : > { %v2397_v30 = vpop.eup %2396 }
 0x446   : > { %v1382_v32 = vmul.f32 %v2397_v30, %v2389_v18 }
 0x448   : > { %v1386_v33 = vpack.c.bf16 %v1382_v32, %v1382_v32 }
 0x449   : > { %v2399_v34 = vpop.eup %2398 }
 0x44a   : > { %v1383_v37 = vmul.f32 %v2399_v34, %v2391_v20  ;;  %2281 = vmatmul.mubr.msk.bf16.vlgmr.msra.gmra.mrb[32].mxu0 %vm1157_vm2, %v1386_v33 }
 0x44b   : > { %2291 = vmatpush3.bf16.msra.mxu0 %v1491_v35  ;;  %2292 = vmatprep.mubr.msk.bf16.mxu0 %vm2417_vm1, %v2416_v9 }
 0x44c   : > { %v1387_v38 = vpack.c.bf16 %v1383_v37, %v1383_v37  ;;  %2302 = vmatprep.subr.bf16.mxu0 %v2416_v9 }
 0x44d   : > { %v2401_v39 = vpop.eup %2400 }
 0x44e   : > { %v2403_v40 = vpop.eup %2402  ;;  %2287 = vmatmul.mubr.msk.bf16.vlgmr.msra.gmra.mrb[32].mxu1 %vm1157_vm2, %v1387_v38  ;;  %v1385_v44 = vmul.f32 %v2401_v39, %v2393_v22 }
 0x44f   : > { %v1384_v43 = vmul.f32 %v2403_v40, %v2395_v23  ;;  %2297 = vmatpush3.bf16.msra.mxu1 %v1537_v42  ;;  %2298 = vmatprep.mubr.msk.bf16.mxu1 %vm2417_vm1, %v2416_v9 }
 0x450   : > { %2308 = vmatprep.subr.bf16.mxu1 %v2416_v9  ;;  %v1389_v47 = vpack.c.bf16 %v1385_v44, %v1385_v44 }
 0x451   : > { %v1388_v45 = vpack.c.bf16 %v1384_v43, %v1384_v43  ;;  %v2381_v43 = vld [vmem:[%s2816_s9 + $0x8] sm:$0xff]  }
 0x453   : > { %2293 = vmatmul.mubr.msk.bf16.vlgmr.msra.gmra.mrb[36].mxu0 %vm1157_vm2, %v1388_v45 }
 0x454   : > { %2303 = vmatpush3.bf16.msra.mxu0 %v1591_v46  ;;  %2304 = vmatprep.mubr.msk.bf16.mxu0 %vm2417_vm1, %v2416_v9 }
 0x455   : > { %2314 = vmatprep.subr.bf16.mxu0 %v2416_v9 }
 0x456   : > { %2299 = vmatmul.mubr.msk.bf16.vlgmr.msra.gmra.mrb[36].mxu1 %vm1157_vm2, %v1389_v47  ;;  %v2076_v47 = vld [vmem:[%s2814_s7] ss:$0 sm:$0xff] }
 0x457   : > { %2310 = vmatprep.mubr.msk.bf16.mxu1 %vm2417_vm1, %v2416_v9  ;;  %2309 = vmatpush3.bf16.msra.mxu1 %v1637_v49  ;;  %v2077_v49 = vld [vmem:[%s2815_s8] ss:$0 sm:$0xff] }
 0x458   : > { %2320 = vmatprep.subr.bf16.mxu1 %v2416_v9 }
 0x51d   : > { %v1435_v51 = vpop.f32.mrb[32].mxu0 }
 0x51e   : > { %v1579_v52 = vpack.c.bf16 %v1435_v51, %v1435_v51  ;;  %v2282_v53 = vpop.f32.mrb[33].mxu0 }
 0x51f   : > { %v1438_v55 = vpop.f32.mrb[34].mxu0  ;;  %v2382_v53 = vld [vmem:[%s2818_s11] sm:$0xff]  }
 0x520   : > { %v2283_v57 = vpop.f32.mrb[35].mxu0  ;;  %2305 = vmatmul.mubr.msk.bf16.vlgmr.msra.gmra.mrb[40].mxu0 %vm1157_vm2, %v1579_v52  ;;  %v2384_v55 = vld [vmem:[%s2818_s11 + $0x10] sm:$0xff]  }
 0x521   : > { %v1481_v58 = vpop.f32.mrb[32].mxu1  ;;  %2315 = vmatpush3.bf16.msra.mxu0 %v1683_v54  ;;  %2316 = vmatprep.mubr.msk.bf16.mxu0 %vm2417_vm1, %v2416_v9  ;;  %v2383_v54 = vld [vmem:[%s2818_s11 + $0x8] sm:$0xff]   ;;  %v2078_v57 = vld [vmem:[%s2817_s10] ss:$0 sm:$0xff] }
 0x522   : > { %v1580_v59 = vpack.c.bf16 %v1481_v58, %v1481_v58  ;;  %v2288_v60 = vpop.f32.mrb[33].mxu1  ;;  %2326 = vmatprep.subr.bf16.mxu0 %v2416_v9 }
 0x523   : > { %v1484_v62 = vpop.f32.mrb[34].mxu1 }
 0x524   : > { %v2289_v63 = vpop.f32.mrb[35].mxu1  ;;  %2311 = vmatmul.mubr.msk.bf16.vlgmr.msra.gmra.mrb[40].mxu1 %vm1157_vm2, %v1580_v59 }
 0x525   : > { %2321 = vmatpush3.bf16.msra.mxu1 %v1729_v61  ;;  %2322 = vmatprep.mubr.msk.bf16.mxu1 %vm2417_vm1, %v2416_v9 }
 0x526   : > { %v1527_v1 = vpop.f32.mrb[36].mxu0  ;;  %2334 = vmatprep.subr.bf16.mxu1 %v2416_v9 }
 0x527   : > { %v1581_v2 = vpack.c.bf16 %v1527_v1, %v1527_v1  ;;  %v2294_v3 = vpop.f32.mrb[37].mxu0 }
 0x528   : > { %v1530_v4 = vpop.f32.mrb[38].mxu0 }
 0x529   : > { %v2295_v5 = vpop.f32.mrb[39].mxu0  ;;  %2317 = vmatmul.mubr.msk.bf16.vlgmr.msra.gmra.mrb[44].mxu0 %vm1157_vm2, %v1581_v2  ;;  %v1573_v6 = vpop.f32.mrb[36].mxu1 }
 0x52a   : > { %v1582_v7 = vpack.c.bf16 %v1573_v6, %v1573_v6  ;;  %v2300_v8 = vpop.f32.mrb[37].mxu1  ;;  %2330 = vmatprep.mubr.msk.bf16.mxu0 %vm2417_vm1, %v2416_v9  ;;  %2327 = vmatpush3.bf16.msra.mxu0 %v2380_v41  ;;  %v2082_v5 = vld [vmem:[%s2819_s12] ss:$0 sm:$0xff] }
 0x52b   : > { %v1576_v10 = vpop.f32.mrb[38].mxu1  ;;  %2328 = vmatprep.subr.bf16.mxu0 %v2416_v9 }
 0x52c   : > { %v2301_v11 = vpop.f32.mrb[39].mxu1  ;;  %2323 = vmatmul.mubr.msk.bf16.vlgmr.msra.gmra.mrb[44].mxu1 %vm1157_vm2, %v1582_v7 }
 0x52d   : > { %2342 = vmatprep.mubr.msk.bf16.mxu1 %vm2417_vm1, %v2416_v9  ;;  %2335 = vmatpush3.bf16.msra.mxu1 %v2382_v53 }
 0x52e   : > { %2329 = vmatpush3.bf16.msra.mxu0 %v2381_v43  ;;  %2336 = vmatprep.subr.bf16.mxu1 %v2416_v9 }
 0x531   : > { %2337 = vmatpush3.bf16.msra.mxu1 %v2383_v54 }
 0x532   : > { %2338 = vmatprep.subr.bf16.mxu1 %v2416_v9 }
 0x535   : > { %2339 = vmatpush3.bf16.msra.mxu1 %v2384_v55 }
 0x536   : > { %2340 = vmatprep.subr.bf16.mxu1 %v2416_v9 }
 0x539   : > { %2341 = vmatpush3.bf16.msra.mxu1 %v2385_v56 }
 0x5f3   : > { %v1627_v12 = vpop.f32.mrb[40].mxu0 }
 0x5f4   : > { %v2306_v13 = vpop.f32.mrb[41].mxu0  ;;  %v1771_v17 = vsel %vm440_vm0, %v1627_v12, 0.0 }
 0x5f5   : > { %v1630_v14 = vpop.f32.mrb[42].mxu0 }
 0x5f6   : > { %v2307_v15 = vpop.f32.mrb[43].mxu0 }
 0x5f7   : > { %v1673_v16 = vpop.f32.mrb[40].mxu1 }
 0x5f8   : > { %v1772_v18 = vsel %vm440_vm0, %v1673_v16, 0.0  ;;  %v2312_v19 = vpop.f32.mrb[41].mxu1 }
 0x5f9   : > { %v1773_v20 = vadd.f32 %v1772_v18, %v1771_v17  ;;  %v1676_v21 = vpop.f32.mrb[42].mxu1 }
 0x5fa   : > { %v2313_v22 = vpop.f32.mrb[43].mxu1 }
 0x5fc   : > { %v1719_v23 = vpop.f32.mrb[44].mxu0 }
 0x5fd   : > { %v1774_v24 = vsel %vm440_vm0, %v1719_v23, 0.0  ;;  %v2318_v25 = vpop.f32.mrb[45].mxu0 }
 0x5fe   : > { %v1775_v26 = vadd.f32 %v1774_v24, %v1773_v20  ;;  %v1722_v27 = vpop.f32.mrb[46].mxu0 }
 0x5ff   : > { %v2319_v28 = vpop.f32.mrb[47].mxu0  ;;  %v1765_v29 = vpop.f32.mrb[44].mxu1 }
 0x600   : > { %v1776_v30 = vsel %vm440_vm0, %v1765_v29, 0.0  ;;  %v2324_v31 = vpop.f32.mrb[45].mxu1 }
 0x601   : > { %v1777_v32 = vadd.f32 %v1776_v30, %v1775_v26  ;;  %v1768_v33 = vpop.f32.mrb[46].mxu1 }
 0x602   : > { %v2325_v34 = vpop.f32.mrb[47].mxu1 }
 0x603   : > { %v1778_v35 = vadd.f32 %v1777_v32, %v2504_v0 }
 0x605   : > { %v1781_v36 = vsel %vm440_vm0, %v1778_v35, 0.0 }
 0x606   : > { %1782 = vadd.xlane.f32.xlu0 %v1781_v36 }
 0x693   : > { %v1783_v37 = vpop.xlane.xlu0 %1782 }
 0x694   : > { %v1784_v38 = vmul.f32 0.03125, %v1783_v37 }
 0x696   : > { %v1785_v39 = vsub.f32 %v1778_v35, %v1784_v38 }
 0x698   : > { %v1786_v40 = vmul.f32 %v1785_v39, %v1785_v39 }
 0x69a   : > { %v1787_v42 = vsel %vm440_vm0, %v1786_v40, 0.0 }
 0x69b   : > { %1788 = vadd.xlane.f32.xlu1 %v1787_v42 }
 0x728   : > { %v1789_v0 = vpop.xlane.xlu1 %1788 }
 0x729   : > { %v1790_v44 = vmul.f32 0.03125, %v1789_v0 }
 0x72b   : > { %v1791_v45 = vadd.f32 1e-05, %v1790_v44 }
 0x72d   : > { %2404 = vrsqrt.f32 %v1791_v45 }
 0x737   : > { %v2405_v46 = vpop.eup %2404 }
 0x738   : > { %v1793_v48 = vmul.f32 %v2405_v46, %v1785_v39 }
 0x73a   : > { %v1800_v50 = vmul.f32 %v2076_v47, %v1793_v48 }
 0x73c   : > { %v1807_v51 = vadd.f32 %v2077_v49, %v1800_v50 }
 0x73e   : > { %v1808_v52 = vpack.c.bf16 %v1807_v51, %v1807_v51 }
 0x740   : > { %2331 = vmatmul.mubr.msk.bf16.vlgmr.msra.gmra.mrb[48].mxu0 %vm440_vm0, %v1808_v52 }
 0x813   : > { %v1869_v58 = vpop.f32.mrb[48].mxu0 }
 0x814   : > { %v1870_v59 = vadd.f32 %v2078_v57, %v1869_v58  ;;  %v2332_v60 = vpop.f32.mrb[49].mxu0 }
 0x815   : > { %v1872_v61 = vpop.f32.mrb[50].mxu0 }
 0x816   : > { %v1876_v62 = vmul.f32 0.70710677, %v1870_v59  ;;  %v2333_v63 = vpop.f32.mrb[51].mxu0  ;;  %v1875_v2 = vmul.f32 0.5, %v1870_v59 }
 0x818   : > { %2406 = verf.f32 %v1876_v62 }
 0x822   : > { %v2407_v1 = vpop.eup %2406 }
 0x823   : > { %v1878_v9 = vadd.f32 1.0, %v2407_v1 }
 0x825   : > { %v1879_v3 = vmul.f32 %v1878_v9, %v1875_v2 }
 0x827   : > { %v1880_v4 = vpack.c.bf16 %v1879_v3, %v1879_v3 }
 0x829   : > { %2343 = vmatmul.mubr.msk.bf16.vlgmr.msra.gmra.mrb[48].mxu1 %vm1920_vm4, %v1880_v4 }
 0x8fc   : > { %v1958_v6 = vpop.f32.mrb[48].mxu1 }
 0x8fd   : > { %v1959_v7 = vadd.f32 %v2082_v5, %v1958_v6  ;;  %v2344_v8 = vpop.f32.mrb[49].mxu1 }
 0x8fe   : > { %v1961_v10 = vpop.f32.mrb[50].mxu1 }
 0x8ff   : > { %v1964_v11 = vadd.f32 %v1959_v7, %v1778_v35  ;;  %v2345_v12 = vpop.f32.mrb[51].mxu1 }
 0x901   : > { %1965 = vst.msk [vmem:[%s435_s29] sm:$0xff] %vm440_vm0, %v1964_v11 }
 0x902 PF: > { %s23_s25 = sadd.s32 1, %s2414_s25  }
 0x903   : > { %p20_p4 = scmp.ge.s32.totalorder %s23_s25, 4  }
 0x905   :  { %22 = sbr.rel (!%p20_p4) target bundleno = 1 (0x1), region = 102 }

</bundles_post_ra>
